<compile_context>
chip_gen: v7x
topology: tpu7x:2x2x1
jax: 0.10.0
libtpu: 0.0.40
codegen_flags: <defaults>
</compile_context>

<pallas_src>
import functools

import jax
import jax.numpy as jnp
import numpy as np
from jax import lax  # noqa: F401  (kept for the fori_loop variant noted below)
from jax.experimental import pallas as pl
from jax.experimental.pallas import tpu as pltpu

VARIANCES = (0.1, 0.2)


# ----------------------------------------------------------------------------
# Kernel
# ----------------------------------------------------------------------------
def _build_kernel(lane_chunk, n_chunks):
    """Decode + softmax kernel over blocks:
         loc_ref    [Nb, 4, TP]   rows: dx, dy, dw, dh
         conf_ref   [Nb, C, TP]
         prior_ref  [4, TP]       rows: cx, cy, w, h  (f32)
         boxes_ref  [Nb, 4, TP]   rows: xmin, ymin, xmax, ymax  (f32)
         scores_ref [Nb, C, TP]
    TP = n_chunks * lane_chunk; each chunk's intermediates die at its stores,
    keeping vreg pressure bounded even for large C.
    """
    v_xy, v_wh = VARIANCES  # Python scalars -> no captured array constants.

    def kernel(loc_ref, conf_ref, prior_ref, boxes_ref, scores_ref):
        # Static chunk offsets (n_chunks is a compile-time int).
        # TODO(synk): for very large n_chunks switch to lax.fori_loop + pl.ds.
        for c in range(n_chunks):
            sl = slice(c * lane_chunk, (c + 1) * lane_chunk)
            loc = loc_ref[:, :, sl].astype(jnp.float32)     # [Nb, 4, LC]
            conf = conf_ref[:, :, sl].astype(jnp.float32)   # [Nb, C, LC]
            pr = prior_ref[:, sl]                           # [4, LC] f32

            # ---- box decode (row-batched) -------------------------------
            t_xy = loc[:, 0:2] * v_xy                       # [Nb, 2, LC]
            t_wh = loc[:, 2:4] * v_wh                       # [Nb, 2, LC]
            cxcy = pr[None, 0:2] + t_xy * pr[None, 2:4]     # [Nb, 2, LC]
            half = 0.5 * pr[None, 2:4] * jnp.exp(t_wh)      # one batched EUP exp
            boxes_ref[:, 0:2, sl] = (cxcy - half).astype(boxes_ref.dtype)
            boxes_ref[:, 2:4, sl] = (cxcy + half).astype(boxes_ref.dtype)

            # ---- class softmax over the class (sublane) axis -------------
            m = jnp.max(conf, axis=1, keepdims=True)        # [Nb, 1, LC]
            e = jnp.exp(conf - m)                           # [Nb, C, LC]
            denom = jnp.sum(e, axis=1, keepdims=True)       # [Nb, 1, LC]
            inv = pl.reciprocal(denom, approx=True)         # 1 EUP op / chunk row
            scores_ref[:, :, sl] = (e * inv).astype(scores_ref.dtype)

    return kernel


# ----------------------------------------------------------------------------
# Tiling heuristics
# ----------------------------------------------------------------------------
def _round_up(x, m):
    return ((x + m - 1) // m) * m


def _cdiv(a, b):
    return (a + b - 1) // b


def _vmem_params():
    """(per-step tile budget bytes, scoped vmem limit bytes), generation-aware.

    v7x has only 64 MiB VMEM per TensorCore, v5e/v6e have 128 MiB; size the
    double-buffered working set so the same code never OOMs on v7x while
    v5e/v6e still get large tiles.
    """
    cap = None
    try:
        info = pltpu.get_tpu_info()
        cap = getattr(info, "vmem_capacity_bytes", None)
    except Exception:
        cap = None
    if cap is None:
        cap = 64 * 1024 * 1024                      # conservative: v7x per-TC
    if cap >= 100 * 1024 * 1024:                    # v5e / v6e (128 MiB)
        return 40 * 1024 * 1024, 64 * 1024 * 1024
    return 20 * 1024 * 1024, 48 * 1024 * 1024       # v7x (64 MiB)


def _choose_lane_chunk(num_classes, P):
    """Lane-chunk width: keep ~3 live f32 (4+C)-row slabs near the 256 KiB
    vreg file to avoid spill traffic; multiple of 128 (lane-dense)."""
    vreg_budget = 192 * 1024
    rows = 3 * (4 + num_classes)
    lc = (vreg_budget // (rows * 4)) // 128 * 128
    lc = max(128, min(int(lc), 2048))
    return int(min(lc, _round_up(P, 128)))


def _choose_tiles(P, N, C, in_bytes, out_bytes, lane_chunk, budget_bytes):
    """Pick (TP, Nblk): maximize the lane tile first, then fold batch rows
    into the block with whatever budget is left. Everything double-buffered."""
    per_lane_n = (4 + C) * in_bytes + 4 * 4 + C * out_bytes   # loc+conf in, boxes f32 + scores out
    per_lane_prior = 4 * 4                                    # priors f32, shared over n
    p_ceil = _round_up(P, lane_chunk)

    tp = (budget_bytes // (2 * (per_lane_n + per_lane_prior))) // lane_chunk * lane_chunk
    tp = int(max(lane_chunk, min(tp, p_ceil)))

    fixed = 2 * per_lane_prior * tp
    per_n_step = 2 * per_lane_n * tp
    nblk = int(max(1, min(N, (budget_bytes - fixed) // max(per_n_step, 1))))

    # Keep at least 2 grid steps so both v7x TensorCores get work.
    num_p = _cdiv(P, tp)
    num_n = _cdiv(N, nblk)
    if num_p * num_n < 2:
        if N > 1:
            nblk = _cdiv(N, 2)            # split the batch axis (keeps TP large)
        elif P > lane_chunk and tp > lane_chunk:
            tp = _round_up(_cdiv(P, 2), lane_chunk)
    return tp, nblk


# ----------------------------------------------------------------------------
# Forward
# ----------------------------------------------------------------------------
@functools.partial(jax.jit, static_argnames=("num_classes", "channel_major"))
def prior_forward(predictions, priors, num_classes, channel_major=True,
                  targets=None):
    """Inference branch of Prior.forward.

    Args:
      predictions: list of (loc, conf) raw NCHW heads per scale level,
        loc: [N, A*4, H, W], conf: [N, A*C, H, W].
      priors: [P, 4] anchor boxes in (cx, cy, w, h).
      channel_major: if True (default, fastest), return boxes [N, 4, P] (f32)
        and scores [N, C, P]; if False, return [N, P, 4] / [N, P, C]
        (costs an extra HBM transpose pass — prefer fusing that layout change
        into the downstream NMS / top-k consumer).
    Returns:
      boxes (decoded xmin, ymin, xmax, ymax) and scores (softmax over classes).
      NOTE: scores use an approximate EUP reciprocal, so rows sum to 1 only to
      ~1e-3; fine for argmax / thresholding.
    """
    if targets is not None:
        # TODO(synk): training branch (matching + loss) is abstract in the
        #             PyTorch base class; not implemented.
        raise NotImplementedError("Prior training branch is not implemented.")

    # --- NCHW heads -> channel-major [N, k, P_level], one transpose each ----
    # element [n, c, (h, w, a)] == head[n, a*k + c, h, w]  (identical ordering
    # to PyTorch permute(0,2,3,1).reshape(n, -1, k)).
    locs_cm, confs_cm = [], []
    for loc_l, conf_l in predictions:
        n, c4, h, w = loc_l.shape
        a = c4 // 4
        locs_cm.append(
            jnp.transpose(loc_l.reshape(n, a, 4, h, w), (0, 2, 3, 4, 1))
            .reshape(n, 4, -1))
        confs_cm.append(
            jnp.transpose(conf_l.reshape(n, a, num_classes, h, w), (0, 2, 3, 4, 1))
            .reshape(n, num_classes, -1))

    loc_cm = jnp.concatenate(locs_cm, axis=2)    # [N, 4, P]  native dtype
    conf_cm = jnp.concatenate(confs_cm, axis=2)  # [N, C, P]  native dtype
    N, _, P = loc_cm.shape
    C = num_classes
    in_dtype = conf_cm.dtype
    score_dtype = in_dtype
    box_dtype = jnp.float32                      # keep box corners in f32

    priors_cm = jnp.transpose(priors.astype(jnp.float32), (1, 0))  # [4, P]

    # --- tiling -------------------------------------------------------------
    budget_bytes, vmem_limit = _vmem_params()
    in_bytes = jnp.dtype(in_dtype).itemsize
    out_bytes = jnp.dtype(score_dtype).itemsize
    lane_chunk = _choose_lane_chunk(C, P)
    TP, Nblk = _choose_tiles(P, N, C, in_bytes, out_bytes, lane_chunk,
                             budget_bytes)
    n_chunks = TP // lane_chunk
    num_p_tiles = _cdiv(P, TP)
    num_n_blocks = _cdiv(N, Nblk)

    # No jnp.pad of loc/conf and no output slice: Pallas masks the ragged last
    # p-tile (and ragged last n-tile) — tail lanes compute garbage but their
    # stores are masked, so no extra HBM pass is spent on padding.
    # NOTE: if profiling shows exposed DMA, bump the conf/scores specs to
    # pipeline_mode=pl.Buffered(3) and account for it in _choose_tiles.
    grid_spec = pl.GridSpec(
        grid=(num_p_tiles, num_n_blocks),          # p outer, n inner
        in_specs=[
            pl.BlockSpec((Nblk, 4, TP), lambda p, n: (n, 0, p)),
            pl.BlockSpec((Nblk, C, TP), lambda p, n: (n, 0, p)),
            pl.BlockSpec((4, TP), lambda p, n: (0, p)),   # constant over inner n
        ],
        out_specs=(
            pl.BlockSpec((Nblk, 4, TP), lambda p, n: (n, 0, p)),
            pl.BlockSpec((Nblk, C, TP), lambda p, n: (n, 0, p)),
        ),
    )

    boxes_cm, scores_cm = pl.pallas_call(
        _build_kernel(lane_chunk, n_chunks),
        out_shape=(jax.ShapeDtypeStruct((N, 4, P), box_dtype),
                   jax.ShapeDtypeStruct((N, C, P), score_dtype)),
        grid_spec=grid_spec,
        compiler_params=pltpu.CompilerParams(
            dimension_semantics=("parallel", "parallel"),
            vmem_limit_bytes=vmem_limit),
    )(loc_cm, conf_cm, priors_cm)

    if channel_major:
        return boxes_cm, scores_cm
    return jnp.transpose(boxes_cm, (0, 2, 1)), jnp.transpose(scores_cm, (0, 2, 1))


# ----------------------------------------------------------------------------
# Anchors + pure-JAX reference
# ----------------------------------------------------------------------------
def make_priors(feat_sizes, anchor_scales):
    """Deterministic SSD-style square anchors, ordered (h, w, a) per level."""
    all_p = []
    for (fh, fw), scales in zip(feat_sizes, anchor_scales):
        ys = (jnp.arange(fh, dtype=jnp.float32) + 0.5) / fh
        xs = (jnp.arange(fw, dtype=jnp.float32) + 0.5) / fw
        cy, cx = jnp.meshgrid(ys, xs, indexing="ij")             # [fh, fw]
        per_anchor = []
        for s in scales:
            wh = jnp.full_like(cx, s)
            per_anchor.append(jnp.stack([cx, cy, wh, wh], axis=-1))  # [fh, fw, 4]
        p = jnp.stack(per_anchor, axis=2)                        # [fh, fw, A, 4]
        all_p.append(p.reshape(-1, 4))
    return jnp.concatenate(all_p, axis=0)                        # [P, 4]


def _reference(predictions, priors, num_classes):
    """Pure-JAX reference (same math as PyTorch SSD decode, no Pallas)."""
    locs, confs = [], []
    for loc_l, conf_l in predictions:
        n = loc_l.shape[0]
        locs.append(jnp.transpose(loc_l, (0, 2, 3, 1)).reshape(n, -1, 4))
        confs.append(jnp.transpose(conf_l, (0, 2, 3, 1)).reshape(n, -1, num_classes))
    loc = jnp.concatenate(locs, axis=1).astype(jnp.float32)
    conf = jnp.concatenate(confs, axis=1).astype(jnp.float32)
    pcx, pcy, pw, ph = priors[:, 0], priors[:, 1], priors[:, 2], priors[:, 3]
    cx = pcx[None] + loc[..., 0] * VARIANCES[0] * pw[None]
    cy = pcy[None] + loc[..., 1] * VARIANCES[0] * ph[None]
    w = pw[None] * jnp.exp(loc[..., 2] * VARIANCES[1])
    h = ph[None] * jnp.exp(loc[..., 3] * VARIANCES[1])
    boxes = jnp.stack([cx - 0.5 * w, cy - 0.5 * h, cx + 0.5 * w, cy + 0.5 * h], axis=-1)
    scores = jax.nn.softmax(conf, axis=-1)
    return boxes, scores


# ----------------------------------------------------------------------------
# Self-test
# ----------------------------------------------------------------------------
def _run_case(key, N, C, A, feat_sizes, anchor_scales):
    predictions = []
    for (fh, fw) in feat_sizes:
        key, k1, k2 = jax.random.split(key, 3)
        loc_l = jax.random.normal(k1, (N, A * 4, fh, fw), dtype=jnp.float32)
        conf_l = jax.random.normal(k2, (N, A * C, fh, fw), dtype=jnp.float32)
        predictions.append((loc_l, conf_l))
    priors = make_priors(feat_sizes, anchor_scales)              # [P, 4]

    boxes_cm, scores_cm = prior_forward(predictions, priors, num_classes=C)
    jax.block_until_ready((boxes_cm, scores_cm))

    ref_boxes, ref_scores = _reference(predictions, priors, C)
    np.testing.assert_allclose(
        np.asarray(boxes_cm), np.asarray(jnp.transpose(ref_boxes, (0, 2, 1))),
        rtol=1e-5, atol=1e-5)
    # softmax uses an approximate EUP reciprocal -> slightly looser tolerance
    np.testing.assert_allclose(
        np.asarray(scores_cm), np.asarray(jnp.transpose(ref_scores, (0, 2, 1))),
        rtol=5e-3, atol=5e-3)
    return key


if __name__ == "__main__":
    key = jax.random.PRNGKey(0)

    # Case 1: tiny config (P = 160, ragged single tile, single lane chunk).
    key = _run_case(key, N=2, C=4, A=2,
                    feat_sizes=[(8, 8), (4, 4)],
                    anchor_scales=[(0.2, 0.3), (0.4, 0.6)])

    # Case 2: larger P (= 2560) so the kernel's lane-chunk loop and the
    # ragged last-tile masking (TP > remaining P) are both exercised.
    key = _run_case(key, N=2, C=4, A=2,
                    feat_sizes=[(32, 32), (16, 16)],
                    anchor_scales=[(0.1, 0.2), (0.3, 0.5)])

    print("KERNEL_OK")
</pallas_src>

<mosaic_0001>
module attributes {stable_mosaic.version = 11 : i64} {
  func.func @kernel(%arg0: i32, %arg1: i32, %arg2: memref<1x4x256xf32, #tpu.memory_space<vmem>>, %arg3: memref<1x4x256xf32, #tpu.memory_space<vmem>>, %arg4: memref<4x256xf32, #tpu.memory_space<vmem>>, %arg5: memref<1x4x256xf32, #tpu.memory_space<vmem>>, %arg6: memref<1x4x256xf32, #tpu.memory_space<vmem>>) attributes {dimension_semantics = [#tpu.dimension_semantics<parallel>, #tpu.dimension_semantics<parallel>], iteration_bounds = array<i64: 1, 2>, scalar_prefetch = 0 : i64, scratch_operands = 0 : i64, tpu.core_type = #tpu.core_type<tc>, window_params = [{transform_indices = @transform_0, window_bounds = array<i64: 1, 4, 256>}, {transform_indices = @transform_1, window_bounds = array<i64: 1, 4, 256>}, {transform_indices = @transform_2, window_bounds = array<i64: 4, 256>}, {transform_indices = @transform_3, window_bounds = array<i64: 1, 4, 256>}, {transform_indices = @transform_4, window_bounds = array<i64: 1, 4, 256>}]} {
    %c0 = arith.constant 0 : index
    %c0_0 = arith.constant 0 : index
    %c0_1 = arith.constant 0 : index
    %0 = vector.load %arg2[%c0, %c0_0, %c0_1] : memref<1x4x256xf32, #tpu.memory_space<vmem>>, vector<1x4x256xf32>
    %c0_2 = arith.constant 0 : index
    %c0_3 = arith.constant 0 : index
    %c0_4 = arith.constant 0 : index
    %1 = vector.load %arg3[%c0_2, %c0_3, %c0_4] : memref<1x4x256xf32, #tpu.memory_space<vmem>>, vector<1x4x256xf32>
    %c0_5 = arith.constant 0 : index
    %c0_6 = arith.constant 0 : index
    %2 = vector.load %arg4[%c0_5, %c0_6] : memref<4x256xf32, #tpu.memory_space<vmem>>, vector<4x256xf32>
    %3 = vector.extract_strided_slice %0 {offsets = [0, 0, 0], sizes = [1, 2, 256], strides = [1, 1, 1]} : vector<1x4x256xf32> to vector<1x2x256xf32>
    %cst = arith.constant 1.000000e-01 : f32
    %4 = vector.broadcast %cst : f32 to vector<1x2x256xf32>
    %5 = arith.mulf %3, %4 : vector<1x2x256xf32>
    %6 = vector.extract_strided_slice %0 {offsets = [0, 2, 0], sizes = [1, 2, 256], strides = [1, 1, 1]} : vector<1x4x256xf32> to vector<1x2x256xf32>
    %cst_7 = arith.constant 2.000000e-01 : f32
    %7 = vector.broadcast %cst_7 : f32 to vector<1x2x256xf32>
    %8 = arith.mulf %6, %7 : vector<1x2x256xf32>
    %9 = vector.extract_strided_slice %2 {offsets = [0, 0], sizes = [2, 256], strides = [1, 1]} : vector<4x256xf32> to vector<2x256xf32>
    %10 = vector.shape_cast %9 : vector<2x256xf32> to vector<1x2x256xf32>
    %11 = vector.extract_strided_slice %2 {offsets = [2, 0], sizes = [2, 256], strides = [1, 1]} : vector<4x256xf32> to vector<2x256xf32>
    %12 = vector.shape_cast %11 : vector<2x256xf32> to vector<1x2x256xf32>
    %13 = arith.mulf %5, %12 : vector<1x2x256xf32>
    %14 = arith.addf %10, %13 : vector<1x2x256xf32>
    %15 = vector.extract_strided_slice %2 {offsets = [2, 0], sizes = [2, 256], strides = [1, 1]} : vector<4x256xf32> to vector<2x256xf32>
    %16 = vector.shape_cast %15 : vector<2x256xf32> to vector<1x2x256xf32>
    %cst_8 = arith.constant 5.000000e-01 : f32
    %17 = vector.broadcast %cst_8 : f32 to vector<1x2x256xf32>
    %18 = arith.mulf %17, %16 : vector<1x2x256xf32>
    %19 = math.exp %8 : vector<1x2x256xf32>
    %20 = arith.mulf %18, %19 : vector<1x2x256xf32>
    %21 = arith.subf %14, %20 : vector<1x2x256xf32>
    %c0_9 = arith.constant 0 : index
    %c0_10 = arith.constant 0 : index
    %c0_11 = arith.constant 0 : index
    %22 = vector.load %arg5[%c0_9, %c0_10, %c0_11] : memref<1x4x256xf32, #tpu.memory_space<vmem>>, vector<1x2x256xf32>
    tpu.vector_store %arg5[%c0_9, %c0_10, %c0_11], %21 {strides = array<i32>} : memref<1x4x256xf32, #tpu.memory_space<vmem>>, vector<1x2x256xf32>,
    %23 = arith.addf %14, %20 : vector<1x2x256xf32>
    %c0_12 = arith.constant 0 : index
    %c2 = arith.constant 2 : index
    %c0_13 = arith.constant 0 : index
    %24 = vector.load %arg5[%c0_12, %c2, %c0_13] : memref<1x4x256xf32, #tpu.memory_space<vmem>>, vector<1x2x256xf32>
    tpu.vector_store %arg5[%c0_12, %c2, %c0_13], %23 {strides = array<i32>} : memref<1x4x256xf32, #tpu.memory_space<vmem>>, vector<1x2x256xf32>,
    %cst_14 = arith.constant dense<0xFF800000> : vector<1x256xf32>
    %25 = vector.multi_reduction <maximumf>, %1, %cst_14 [1] : vector<1x4x256xf32> to vector<1x256xf32>
    %26 = vector.shape_cast %25 : vector<1x256xf32> to vector<1x1x256xf32>
    %27 = vector.broadcast %26 : vector<1x1x256xf32> to vector<1x4x256xf32>
    %28 = arith.subf %1, %27 : vector<1x4x256xf32>
    %29 = math.exp %28 : vector<1x4x256xf32>
    %cst_15 = arith.constant dense<0.000000e+00> : vector<1x256xf32>
    %30 = vector.multi_reduction <add>, %29, %cst_15 [1] : vector<1x4x256xf32> to vector<1x256xf32>
    %31 = vector.shape_cast %30 : vector<1x256xf32> to vector<1x1x256xf32>
    %32 = tpu.reciprocal %31 {approx = true} : vector<1x1x256xf32> -> vector<1x1x256xf32>
    %33 = vector.broadcast %32 : vector<1x1x256xf32> to vector<1x4x256xf32>
    %34 = arith.mulf %29, %33 : vector<1x4x256xf32>
    %c0_16 = arith.constant 0 : index
    %c0_17 = arith.constant 0 : index
    %c0_18 = arith.constant 0 : index
    %35 = vector.load %arg6[%c0_16, %c0_17, %c0_18] : memref<1x4x256xf32, #tpu.memory_space<vmem>>, vector<1x4x256xf32>
    tpu.vector_store %arg6[%c0_16, %c0_17, %c0_18], %34 {strides = array<i32>} : memref<1x4x256xf32, #tpu.memory_space<vmem>>, vector<1x4x256xf32>,
    return
  }
  func.func @transform_0(%arg0: i32, %arg1: i32) -> (i32, i32, i32) {
    %c0_i32 = arith.constant 0 : i32
    %c0_i32_0 = arith.constant 0 : i32
    return %arg1, %c0_i32, %arg0 : i32, i32, i32
  }
  func.func @transform_1(%arg0: i32, %arg1: i32) -> (i32, i32, i32) {
    %c0_i32 = arith.constant 0 : i32
    %c0_i32_0 = arith.constant 0 : i32
    return %arg1, %c0_i32, %arg0 : i32, i32, i32
  }
  func.func @transform_2(%arg0: i32, %arg1: i32) -> (i32, i32) {
    %c0_i32 = arith.constant 0 : i32
    %c0_i32_0 = arith.constant 0 : i32
    return %c0_i32, %arg0 : i32, i32
  }
  func.func @transform_3(%arg0: i32, %arg1: i32) -> (i32, i32, i32) {
    %c0_i32 = arith.constant 0 : i32
    %c0_i32_0 = arith.constant 0 : i32
    return %arg1, %c0_i32, %arg0 : i32, i32, i32
  }
  func.func @transform_4(%arg0: i32, %arg1: i32) -> (i32, i32, i32) {
    %c0_i32 = arith.constant 0 : i32
    %c0_i32_0 = arith.constant 0 : i32
    return %arg1, %c0_i32, %arg0 : i32, i32, i32
  }
}

</mosaic_0001>

<bundles_post_ra>
// kernel: prior_forward.1
= control target key start
LH: loop header
LB: loop body
LE: loop exit
PB: predicated region body
PF: predicated region fallthrough
CT: control target
= control target key end

     0   :  { %10 = vsyncpa [#allocation3], 0  ;;  %s953_s0 = inlined_call_operand.vmem [shape: f32[2,4,160], index: 0, kind: input, shape index: {}]   ;;  %s954_s1 = inlined_call_operand.vmem [shape: f32[2,4,160], index: 1, kind: input, shape index: {}]   ;;  %s955_s2 = inlined_call_operand.vmem [shape: f32[4,160], index: 2, kind: input, shape index: {}]   ;;  %s956_s3 = inlined_call_operand.hbm [shape: f32[2,4,160], index: 3, kind: output, shape index: {0}]   ;;  %s957_s4 = inlined_call_operand.hbm [shape: f32[2,4,160], index: 4, kind: output, shape index: {1}]  }
   0x1   :  { %12 = vsyncpa [#allocation3 + $0x1], 0 }
   0x2   :  { %13 = vsyncpa [#allocation5], 0 }
   0x3   :  { %15 = vsyncpa [#allocation5 + $0x1], 0  ;;  %s790_s15 = smov 0   ;;  %s792_s16 = smov 0  }
   0x4   :  { %s794_s17 = smov 0   ;;  %s796_s18 = smov 0  }
   0x5   :  { %s798_s19 = smov 0   ;;  %s800_s20 = smov 0  }
   0x6 LB: > { %s557_s21 = sadd.s32 4294967295, %s761_s20   ;;  %s558_s22 = sadd.s32 4294967294, %s761_s20   ;;  %s761_s20 = sphi %s800_s20, %s21_s20   ;;  %s757_s19 = sphi %s798_s19, %s964_s19   ;;  %s753_s18 = sphi %s796_s18, %s963_s18   ;;  %s749_s17 = sphi %s794_s17, %s962_s17   ;;  %s745_s16 = sphi %s792_s16, %s961_s16   ;;  %s741_s15 = sphi %s790_s15, %s960_s15  }
   0x7   : > { %s30_s23 = sadd.s32 1, %s757_s19  ;;  %s124_s24 = sadd.s32 1, %s749_s17 }
   0x8   : > { %p31_p0 = scmp.ge.s32.totalorder %s30_s23, 2  ;;  %p134_p1 = scmp.ne.s32.totalorder %s749_s17, %s745_s16 }
   0x9   : > { %p135_p2 = scmp.eq.s32.totalorder %s557_s21, 1  ;;  %p140_p3 = scmp.ne.s32.totalorder %s745_s16, %s741_s15 }
   0xa   : > { %s966_s23 = smov (%p31_p0, %s30_s23), 0  ;;  %p141_p5 = scmp.eq.s32.totalorder %s558_s22, 1 }
   0xb   : > { %p830_p4 = por %p135_p2, %p134_p1  ;;  %s119_s26 = ssub.s32 %s757_s19, %s966_s23 }
   0xc   : > { %p562_p6 = scmp.ge.s32.totalorder %s761_s20, 1  ;;  %p122_p7 = scmp.eq.s32.totalorder %s119_s26, 0 }
   0xd   : > { %p837_p8 = por %p141_p5, %p140_p3  ;;  %p222_p9 = scmp.lt.s32.totalorder %s761_s20, 3 }
   0xe   : > { %s843_s28 = scalar_select %p122_p7, %s749_s17, %s124_s24  }
   0xf   : > { %p223_p10 = pnand %p562_p6, %p222_p9 }
  0x10   : > { %p272_p11 = scmp.lt.s32.totalorder (!%p223_p10), %s753_s18, 1  ;;  %vm328_vm0 = vcmask (!%p223_p10), 1043456   ;;  %v301_v14 = vld [vmem:[%s955_s2] sm:$0xff] (!%p223_p10)  ;;  %s859_s13 = sand.u32 (!%p223_p10), 1, %s745_s16  }
  0x11   : > { %226 = sbr.rel (%p223_p10) target bundleno = 112 (0x70), region = 32  ;;  %v569_v16 = vrot.slane (!%p223_p10), %v301_v14, 10  ;;  %v310_v19 = vmul.f32 (!%p223_p10), 0.5, %v301_v14  ;;  %s563_s14 = sshll.u32 (!%p223_p10), %s859_s13, 3 }
  0x12   : > { %s263_s21 = scalar_lea.vmem (!%p223_p10), [#allocation2], %s563_s14  ;;  %s580_s24 = sshll.u32 (!%p223_p10), %s753_s18, 7 }
  0x13   : > { %s397_s22 = sshll.u32 (!%p223_p10), %s263_s21, 4  ;;  %s376_s5 = scalar_lea.sflag (!%p223_p10), [#allocation3], %s859_s13  ;;  %s865_s22 = int_to_ptr.vmem [resolvable:$true] %s397_s22 }
  0x14   : > { %s651_s6 = scalar_lea.vmem (!%p223_p10), %s865_s22, 128 }
  0x15   : > { %p652_p12 = scmp.ne.s32.totalorder (!%p223_p10), %s865_s22, %s651_s6 }
  0x17   : > { %p653_p13 = pnand (!%p223_p10), %p652_p12, %p830_p4 }
  0x18   : > { %s273_s29 = scalar_select %p272_p11, %s753_s18, 1 }
  0x19   : > { %p654_p0 = pneg %p653_p13 }
  0x1a   : > { %s578_s30 = sshll.u32 %s273_s29, 3 }
  0x1b   : > { %s279_s7 = scalar_lea.vmem %s953_s0, %s578_s30  ;;  %s289_s10 = scalar_lea.vmem %s954_s1, %s578_s30 }
  0x1c   : > { %v299_v0 = vld [vmem:[%s279_s7] sm:$0xff]  ;;  %s872_s30 = scalar_lea.hbm %s956_s3, %s580_s24  ;;  %s763_s7 = smov [#allocation2]  }
  0x1d   : > { %v300_v1 = vld [vmem:[%s289_s10] sm:$0xff]  ;;  %v303_v2 = vmul.f32 0.2, %v299_v0  ;;  %v302_v15 = vmul.f32 0.1, %v299_v0  ;;  %s655_s8 = sshll.u32 %s763_s7, 4  ;;  %s656_s8 = int_to_ptr.vmem [resolvable:$false] %s655_s8 }
  0x1e   : > { %v326_v3 = vcombine.high %v300_v1, %v300_v1  ;;  %v329_v4 = vsel %vm328_vm0, %v300_v1, -inf  ;;  %s657_s9 = scalar_lea.vmem %s656_s8, 256  ;;  %p658_p1 = scmp.lt.s32.totalorder %s865_s22, %s656_s8 }
  0x1f   : > { %v330_v5 = vrot.slane %v329_v4, 4  ;;  %v311_v6 = vmul.f32 1.442695, %v303_v2  ;;  %v308_v22 = vmul.f32 %v569_v16, %v302_v15  ;;  %p659_p2 = scmp.lt.s32.totalorder %s657_s9, %s651_s6 }
  0x20   : > { %v336_v7 = vsel %vm328_vm0, %v326_v3, -inf }
  0x21   : > { %v331_v8 = vmax.f32 %v329_v4, %v330_v5  ;;  %v337_v9 = vrot.slane %v336_v7, 4  ;;  %643 = vpow2.f32 %v311_v6  ;;  %v309_v27 = vadd.f32 %v308_v22, %v301_v14  ;;  %p660_p3 = por %p659_p2, %p658_p1 }
  0x23   : > { %v332_v10 = vrot.slane %v331_v8, 2  ;;  %v338_v11 = vmax.f32 %v336_v7, %v337_v9  ;;  %p661_p5 = pnand %p660_p3, %p654_p0 }
  0x25   : > { %v333_v12 = vmax.f32 %v331_v8, %v332_v10  ;;  %v339_v13 = vrot.slane %v338_v11, 2 }
  0x27   : > { %v334_v17 = vrot.slane %v333_v12, 1  ;;  %v340_v18 = vmax.f32 %v338_v11, %v339_v13 }
  0x29   : > { %v335_v20 = vmax.f32 %v333_v12, %v334_v17  ;;  %v341_v21 = vrot.slane %v340_v18, 1 }
  0x2b   : > { %v342_v23 = vmax.f32 %v340_v18, %v341_v21  ;;  %v644_v24 = vpop.eup %643 }
  0x2c   : > { %v313_v25 = vmul.f32 %v644_v24, %v310_v19 }
  0x2d   : > { %v345_v26 = vcombine.low %v335_v20, %v342_v23 }
  0x2e   : > { %v315_v28 = vrot.slane %v313_v25, 6 }
  0x2f   : > { %v347_v29 = vsub.f32 %v300_v1, %v345_v26 }
  0x30   : > { %v316_v30 = vrot.slane %v315_v28, 4 }
  0x31   : > { %v348_v31 = vmul.f32 1.442695, %v347_v29 }
  0x32   : > { %v318_v32 = vsub.f32 %v309_v27, %v316_v30  ;;  %v320_v33 = vadd.f32 %v316_v30, %v309_v27 }
  0x33   : > { %645 = vpow2.f32 %v348_v31 }
  0x34   : > { %319 = vst [vmem:[%s263_s21] sm:$0x33] %v318_v32  ;;  %v322_v34 = vrot.slane %v320_v33, 6 }
  0x36   : > { %324 = vst [vmem:[%s263_s21] sm:$0xcc] %v322_v34 }
  0x37   : > { %664 = shalt.err (!%p661_p5)
}
  0x38   : > { %s665_s10 = scalar_lea.hbm %s872_s30, 128  ;;  %s669_s21 = scalar_lea.hbm %s956_s3, 256 }
  0x39   : > { %p666_p6 = scmp.ne.s32.totalorder %s872_s30, %s665_s10  ;;  %p670_p10 = scmp.lt.u32.totalorder %s872_s30, %s956_s3 }
  0x3a   : > { %p671_p11 = scmp.lt.u32.totalorder %s669_s21, %s665_s10  ;;  %p673_p13 = scmp.lt.u32.totalorder %s665_s10, %s872_s30 }
  0x3b   : > { %p667_p7 = pnand %p666_p6, %p830_p4 }
  0x3c   : > { %p672_p12 = por %p671_p11, %p670_p10 }
  0x3d   : > { %p668_p9 = pneg %p667_p7 }
  0x3e   : > { %p674_p0 = por %p673_p13, %p672_p12 }
  0x40   : > { %p675_p1 = pnand %p674_p0, %p668_p9 }
  0x42   : > { %678 = shalt.err (!%p675_p1)
}
  0x43   : > { %582 = dma.vmem_to_hbm [thread:$0]  (%p830_p4), %s865_s22, 128, %s872_s30, %s376_s5   ;;  %v646_v35 = vpop.eup %645 }
  0x44   : > { %v351_v36 = vcombine.high %v646_v35, %v646_v35  ;;  %v353_v37 = vsel %vm328_vm0, %v646_v35, 0.0  ;;  %s270_s22 = scalar_lea.vmem [#allocation4], %s563_s14  ;;  %s907_s7 = scalar_lea.hbm %s957_s4, %s580_s24 }
  0x45   : > { %v354_v38 = vrot.slane %v353_v37, 4  ;;  %s413_s30 = sshll.u32 %s270_s22, 4  ;;  %s381_s8 = scalar_lea.sflag [#allocation5], %s859_s13  ;;  %s900_s30 = int_to_ptr.vmem [resolvable:$true] %s413_s30 }
  0x46   : > { %v360_v39 = vsel %vm328_vm0, %v351_v36, 0.0  ;;  %s679_s9 = scalar_lea.vmem %s900_s30, 128  ;;  %s764_s14 = smov [#allocation4]  }
  0x47   : > { %v355_v40 = vadd.f32 %v354_v38, %v353_v37  ;;  %v361_v41 = vrot.slane %v360_v39, 4  ;;  %p680_p2 = scmp.ne.s32.totalorder %s900_s30, %s679_s9  ;;  %s683_s10 = sshll.u32 %s764_s14, 4  ;;  %s684_s10 = int_to_ptr.vmem [resolvable:$false] %s683_s10 }
  0x48   : > { %s685_s11 = scalar_lea.vmem %s684_s10, 256  ;;  %p686_p6 = scmp.lt.s32.totalorder %s900_s30, %s684_s10 }
  0x49   : > { %v356_v42 = vrot.slane %v355_v40, 2  ;;  %v362_v43 = vadd.f32 %v361_v41, %v360_v39  ;;  %p681_p3 = pnand %p680_p2, %p830_p4  ;;  %p687_p7 = scmp.lt.s32.totalorder %s685_s11, %s679_s9 }
  0x4b   : > { %v357_v44 = vadd.f32 %v356_v42, %v355_v40  ;;  %v363_v45 = vrot.slane %v362_v43, 2  ;;  %p682_p5 = pneg %p681_p3  ;;  %p688_p9 = por %p687_p7, %p686_p6 }
  0x4d   : > { %v358_v46 = vrot.slane %v357_v44, 1  ;;  %v364_v47 = vadd.f32 %v363_v45, %v362_v43  ;;  %p689_p10 = pnand %p688_p9, %p682_p5 }
  0x4f   : > { %v359_v48 = vadd.f32 %v358_v46, %v357_v44  ;;  %v365_v49 = vrot.slane %v364_v47, 1 }
  0x51   : > { %v366_v50 = vadd.f32 %v365_v49, %v364_v47  ;;  %647 = vrcp.f32 %v359_v48 }
  0x53   : > { %649 = vrcp.f32 %v366_v50 }
  0x5b   : > { %v648_v51 = vpop.eup %647 }
  0x5d   : > { %v650_v52 = vpop.eup %649 }
  0x5e   : > { %v371_v53 = vcombine.low %v648_v51, %v650_v52 }
  0x60   : > { %v373_v54 = vmul.f32 %v646_v35, %v371_v53 }
  0x62   : > { %374 = vst [vmem:[%s270_s22] sm:$0xff] %v373_v54 }
  0x63   : > { %692 = shalt.err (!%p689_p10)
}
  0x64   : > { %s693_s18 = scalar_lea.hbm %s907_s7, 128  ;;  %s697_s12 = scalar_lea.hbm %s957_s4, 256 }
  0x65   : > { %p694_p11 = scmp.ne.s32.totalorder %s907_s7, %s693_s18  ;;  %p698_p0 = scmp.lt.u32.totalorder %s907_s7, %s957_s4 }
  0x66   : > { %p699_p1 = scmp.lt.u32.totalorder %s697_s12, %s693_s18  ;;  %p701_p3 = scmp.lt.u32.totalorder %s693_s18, %s907_s7 }
  0x67   : > { %p695_p12 = pnand %p694_p11, %p830_p4 }
  0x68   : > { %p700_p2 = por %p699_p1, %p698_p0 }
  0x69   : > { %p696_p13 = pneg %p695_p12 }
  0x6a   : > { %p702_p5 = por %p701_p3, %p700_p2 }
  0x6c   : > { %p703_p6 = pnand %p702_p5, %p696_p13 }
  0x6e   : > { %706 = shalt.err (!%p703_p6)
}
  0x6f   : > { %583 = dma.vmem_to_hbm [thread:$0]  (%p830_p4), %s900_s30, 128, %s907_s7, %s381_s8  }
  0x70 PF: > { %p593_p7 = scmp.ge.s32.totalorder %s761_s20, 2  ;;  %s425_s29 = sand.u32 1, %s741_s15  }
  0x71   : > { %s426_s22 = scalar_lea.sflag [#allocation3], %s425_s29 }
  0x72   : > { %p587_p9 = pnand %p593_p7, %p837_p8 }
  0x74   : > { %732 = dma.done.wait (!%p587_p9), %s426_s22, 128  }
  0x75   : > { %734 = vsyncadd (!%p587_p9), %s426_s22, 4294967168  ;;  %s435_s5 = scalar_lea.sflag [#allocation5], %s425_s29 }
  0x76   : > { %736 = dma.done.wait (!%p587_p9), %s435_s5, 128  }
  0x77   : > { %738 = vsyncadd (!%p587_p9), %s435_s5, 4294967168  ;;  %s21_s20 = sadd.s32 1, %s761_s20   ;;  %s960_s15 = smov %s745_s16 }
  0x78   : > { %p18_p10 = scmp.ge.s32.totalorder %s21_s20, 4   ;;  %s961_s16 = smov %s749_s17 }
  0x79   : > { %s962_s17 = smov %s843_s28  ;;  %s963_s18 = smov %s757_s19 }
  0x7a   : > { %s964_s19 = smov %s966_s23  ;;  %20 = sbr.rel (!%p18_p10) target bundleno = 6 (0x6), region = 90 }
  0x81   :  { %440 = vsyncpa [#allocation3], 1 }
  0x82   :  { %442 = vsyncpa [#allocation3 + $0x1], 1 }
  0x83   :  { %443 = vsyncpa [#allocation5], 1 }
  0x84   :  { %445 = vsyncpa [#allocation5 + $0x1], 1 }

</bundles_post_ra>
